<compile_context>
chip_gen: v7x
topology: tpu7x:2x2x1
jax: 0.10.0
libtpu: 0.0.40
codegen_flags: <defaults>
</compile_context>

<pallas_src>
import jax
import jax.numpy as jnp
from jax.experimental import pallas as pl
from jax.experimental.pallas import tpu as pltpu

# ---- scaled-down config (structurally identical to the real one) -----------
VOCAB   = 64      # real: 49408
D_EMBED = 128     # real: 768   (multiple of 128 -> lane-dense rows)
SEQ     = 8       # n_tokens, real: 77
BATCH   = 2


def _round_up(x, m):
    return (x + m - 1) // m * m


# ---------------------------------------------------------------------------
# Kernel: one grid step == one batch element.
#   tok_ref   : (B, S) int32 tokens, scalar-prefetched into SMEM
#   table_hbm : (V, D) token-embedding table, raw HBM ref (no auto-DMA)
#   pos_ref   : (S, D) positional embedding, VMEM-resident (constant block)
#   out_ref   : (1, S, D) output block for this batch element
#   rows_vmem : (S_pad, D) VMEM scratch holding the gathered token rows
#   copy_sems : (S,) DMA semaphores, one per gathered row
# ---------------------------------------------------------------------------
def embed_kernel(tok_ref, table_hbm, pos_ref, out_ref, rows_vmem, copy_sems):
    b = pl.program_id(0)
    S = pos_ref.shape[0]

    def row_copy(s):
        return pltpu.make_async_copy(
            table_hbm.at[pl.ds(tok_ref[b, s], 1), :],   # one (1, D) row gather
            rows_vmem.at[pl.ds(s, 1), :],
            copy_sems.at[s],
        )

    # Fan out all S row gathers before waiting on any of them, so their HBM
    # latencies overlap instead of serializing.
    for s in range(S):
        row_copy(s).start()
    for s in range(S):
        row_copy(s).wait()

    # Single sublane/lane-dense vectorized add + store for the whole block.
    out_ref[0] = rows_vmem[0:S, :] + pos_ref[...]


def clip_embedding(tokens, table, pos):
    B, S = tokens.shape
    V, D = table.shape
    assert pos.shape == (S, D)
    s_pad = _round_up(S, 8)   # sublane-aligned scratch (real S=77 -> 80)

    grid_spec = pltpu.PrefetchScalarGridSpec(
        num_scalar_prefetch=1,                  # `tokens` lands in SMEM
        grid=(B,),
        in_specs=[
            # Token-embedding table: never made VMEM-resident; rows are
            # gathered manually in the kernel body.
            pl.BlockSpec(memory_space=pl.ANY),
            # Positional embedding: whole array, constant block index -> the
            # pipeline DMAs it exactly once and keeps it in VMEM.
            pl.BlockSpec((S, D), lambda b, tok: (0, 0)),
        ],
        out_specs=pl.BlockSpec((1, S, D), lambda b, tok: (b, 0, 0)),
        scratch_shapes=[
            pltpu.VMEM((s_pad, D), table.dtype),
            pltpu.SemaphoreType.DMA((S,)),
        ],
    )

    return pl.pallas_call(
        embed_kernel,
        grid_spec=grid_spec,
        out_shape=jax.ShapeDtypeStruct((B, S, D), table.dtype),
        compiler_params=pltpu.CompilerParams(
            # On v7x, pltpu.CORE_PARALLEL here would shard batch elements
            # across the two TensorCores.
            dimension_semantics=("parallel",),
        ),
    )(tokens, table, pos)


# ---------------------------------------------------------------------------
# Pure-JAX reference (matches nn.Embedding lookup + positional add).
# ---------------------------------------------------------------------------
def ref_forward(tokens, table, pos):
    return table[tokens] + pos[None]


if __name__ == "__main__":
    key = jax.random.PRNGKey(0)
    k_tab, k_pos, k_tok = jax.random.split(key, 3)

    table = jax.random.normal(k_tab, (VOCAB, D_EMBED), jnp.float32) * 0.02
    # nn.Parameter(torch.zeros(...)) in the module; use non-zero values here
    # so the add is actually exercised by the check.
    pos = jax.random.normal(k_pos, (SEQ, D_EMBED), jnp.float32) * 0.02
    tokens = jax.random.randint(k_tok, (BATCH, SEQ), 0, VOCAB, dtype=jnp.int32)

    out = clip_embedding(tokens, table, pos)
    out = jax.block_until_ready(out)

    ref = ref_forward(tokens, table, pos)
    assert out.shape == (BATCH, SEQ, D_EMBED), out.shape
    max_err = float(jnp.max(jnp.abs(out - ref)))
    assert max_err < 1e-6, f"mismatch vs reference: {max_err}"
    print("KERNEL_OK")
</pallas_src>

<mosaic_0001>
module attributes {stable_mosaic.version = 11 : i64} {
  func.func @embed_kernel(%arg0: i32, %arg1: memref<2x8xi32, #tpu.memory_space<smem>>, %arg2: memref<64x128xf32, #tpu.memory_space<any>>, %arg3: memref<8x128xf32, #tpu.memory_space<vmem>>, %arg4: memref<1x8x128xf32, #tpu.memory_space<vmem>>, %arg5: memref<8x128xf32, #tpu.memory_space<vmem>>, %arg6: memref<8x!tpu.dma_semaphore, #tpu.memory_space<semaphore_mem>>) attributes {dimension_semantics = [#tpu.dimension_semantics<parallel>], iteration_bounds = array<i64: 2>, scalar_prefetch = 1 : i64, scratch_operands = 2 : i64, tpu.core_type = #tpu.core_type<tc>, window_params = [{}, {pipeline_mode = #tpu.pipeline_mode<synchronous>, transform_indices = @transform_1, window_bounds = array<i64: 8, 128>}, {transform_indices = @transform_2, window_bounds = array<i64: 1, 8, 128>}]} {
    %0 = arith.index_cast %arg0 : i32 to index
    %c0 = arith.constant 0 : index
    %1 = memref.load %arg1[%0, %c0] : memref<2x8xi32, #tpu.memory_space<smem>>
    %c0_i32 = arith.constant 0 : i32
    %c0_i32_0 = arith.constant 0 : i32
    %2 = tpu.memref_slice %arg2[%1, %c0_i32_0] : memref<64x128xf32, #tpu.memory_space<any>> -> memref<1x128xf32, #tpu.memory_space<any>>
    %c0_i32_1 = arith.constant 0 : i32
    %c0_i32_2 = arith.constant 0 : i32
    %3 = tpu.memref_slice %arg5[%c0_i32_1, %c0_i32_2] : memref<8x128xf32, #tpu.memory_space<vmem>> -> memref<1x128xf32, #tpu.memory_space<vmem>>
    %4 = tpu.memref_slice %arg6[%c0_i32] : memref<8x!tpu.dma_semaphore, #tpu.memory_space<semaphore_mem>> -> memref<1x!tpu.dma_semaphore, #tpu.memory_space<semaphore_mem>>
    %5 = tpu.memref_squeeze %4 : memref<1x!tpu.dma_semaphore, #tpu.memory_space<semaphore_mem>> -> memref<!tpu.dma_semaphore, #tpu.memory_space<semaphore_mem>>
    tpu.enqueue_dma source(%2 : memref<1x128xf32, #tpu.memory_space<any>>) target(%3 : memref<1x128xf32, #tpu.memory_space<vmem>>) target_semaphore(%5 : memref<!tpu.dma_semaphore, #tpu.memory_space<semaphore_mem>>)
    %6 = arith.index_cast %arg0 : i32 to index
    %c1 = arith.constant 1 : index
    %7 = memref.load %arg1[%6, %c1] : memref<2x8xi32, #tpu.memory_space<smem>>
    %c1_i32 = arith.constant 1 : i32
    %c0_i32_3 = arith.constant 0 : i32
    %8 = tpu.memref_slice %arg2[%7, %c0_i32_3] : memref<64x128xf32, #tpu.memory_space<any>> -> memref<1x128xf32, #tpu.memory_space<any>>
    %c1_i32_4 = arith.constant 1 : i32
    %c0_i32_5 = arith.constant 0 : i32
    %9 = tpu.memref_slice %arg5[%c1_i32_4, %c0_i32_5] : memref<8x128xf32, #tpu.memory_space<vmem>> -> memref<1x128xf32, #tpu.memory_space<vmem>>
    %10 = tpu.memref_slice %arg6[%c1_i32] : memref<8x!tpu.dma_semaphore, #tpu.memory_space<semaphore_mem>> -> memref<1x!tpu.dma_semaphore, #tpu.memory_space<semaphore_mem>>
    %11 = tpu.memref_squeeze %10 : memref<1x!tpu.dma_semaphore, #tpu.memory_space<semaphore_mem>> -> memref<!tpu.dma_semaphore, #tpu.memory_space<semaphore_mem>>
    tpu.enqueue_dma source(%8 : memref<1x128xf32, #tpu.memory_space<any>>) target(%9 : memref<1x128xf32, #tpu.memory_space<vmem>>) target_semaphore(%11 : memref<!tpu.dma_semaphore, #tpu.memory_space<semaphore_mem>>)
    %12 = arith.index_cast %arg0 : i32 to index
    %c2 = arith.constant 2 : index
    %13 = memref.load %arg1[%12, %c2] : memref<2x8xi32, #tpu.memory_space<smem>>
    %c2_i32 = arith.constant 2 : i32
    %c0_i32_6 = arith.constant 0 : i32
    %14 = tpu.memref_slice %arg2[%13, %c0_i32_6] : memref<64x128xf32, #tpu.memory_space<any>> -> memref<1x128xf32, #tpu.memory_space<any>>
    %c2_i32_7 = arith.constant 2 : i32
    %c0_i32_8 = arith.constant 0 : i32
    %15 = tpu.memref_slice %arg5[%c2_i32_7, %c0_i32_8] : memref<8x128xf32, #tpu.memory_space<vmem>> -> memref<1x128xf32, #tpu.memory_space<vmem>>
    %16 = tpu.memref_slice %arg6[%c2_i32] : memref<8x!tpu.dma_semaphore, #tpu.memory_space<semaphore_mem>> -> memref<1x!tpu.dma_semaphore, #tpu.memory_space<semaphore_mem>>
    %17 = tpu.memref_squeeze %16 : memref<1x!tpu.dma_semaphore, #tpu.memory_space<semaphore_mem>> -> memref<!tpu.dma_semaphore, #tpu.memory_space<semaphore_mem>>
    tpu.enqueue_dma source(%14 : memref<1x128xf32, #tpu.memory_space<any>>) target(%15 : memref<1x128xf32, #tpu.memory_space<vmem>>) target_semaphore(%17 : memref<!tpu.dma_semaphore, #tpu.memory_space<semaphore_mem>>)
    %18 = arith.index_cast %arg0 : i32 to index
    %c3 = arith.constant 3 : index
    %19 = memref.load %arg1[%18, %c3] : memref<2x8xi32, #tpu.memory_space<smem>>
    %c3_i32 = arith.constant 3 : i32
    %c0_i32_9 = arith.constant 0 : i32
    %20 = tpu.memref_slice %arg2[%19, %c0_i32_9] : memref<64x128xf32, #tpu.memory_space<any>> -> memref<1x128xf32, #tpu.memory_space<any>>
    %c3_i32_10 = arith.constant 3 : i32
    %c0_i32_11 = arith.constant 0 : i32
    %21 = tpu.memref_slice %arg5[%c3_i32_10, %c0_i32_11] : memref<8x128xf32, #tpu.memory_space<vmem>> -> memref<1x128xf32, #tpu.memory_space<vmem>>
    %22 = tpu.memref_slice %arg6[%c3_i32] : memref<8x!tpu.dma_semaphore, #tpu.memory_space<semaphore_mem>> -> memref<1x!tpu.dma_semaphore, #tpu.memory_space<semaphore_mem>>
    %23 = tpu.memref_squeeze %22 : memref<1x!tpu.dma_semaphore, #tpu.memory_space<semaphore_mem>> -> memref<!tpu.dma_semaphore, #tpu.memory_space<semaphore_mem>>
    tpu.enqueue_dma source(%20 : memref<1x128xf32, #tpu.memory_space<any>>) target(%21 : memref<1x128xf32, #tpu.memory_space<vmem>>) target_semaphore(%23 : memref<!tpu.dma_semaphore, #tpu.memory_space<semaphore_mem>>)
    %24 = arith.index_cast %arg0 : i32 to index
    %c4 = arith.constant 4 : index
    %25 = memref.load %arg1[%24, %c4] : memref<2x8xi32, #tpu.memory_space<smem>>
    %c4_i32 = arith.constant 4 : i32
    %c0_i32_12 = arith.constant 0 : i32
    %26 = tpu.memref_slice %arg2[%25, %c0_i32_12] : memref<64x128xf32, #tpu.memory_space<any>> -> memref<1x128xf32, #tpu.memory_space<any>>
    %c4_i32_13 = arith.constant 4 : i32
    %c0_i32_14 = arith.constant 0 : i32
    %27 = tpu.memref_slice %arg5[%c4_i32_13, %c0_i32_14] : memref<8x128xf32, #tpu.memory_space<vmem>> -> memref<1x128xf32, #tpu.memory_space<vmem>>
    %28 = tpu.memref_slice %arg6[%c4_i32] : memref<8x!tpu.dma_semaphore, #tpu.memory_space<semaphore_mem>> -> memref<1x!tpu.dma_semaphore, #tpu.memory_space<semaphore_mem>>
    %29 = tpu.memref_squeeze %28 : memref<1x!tpu.dma_semaphore, #tpu.memory_space<semaphore_mem>> -> memref<!tpu.dma_semaphore, #tpu.memory_space<semaphore_mem>>
    tpu.enqueue_dma source(%26 : memref<1x128xf32, #tpu.memory_space<any>>) target(%27 : memref<1x128xf32, #tpu.memory_space<vmem>>) target_semaphore(%29 : memref<!tpu.dma_semaphore, #tpu.memory_space<semaphore_mem>>)
    %30 = arith.index_cast %arg0 : i32 to index
    %c5 = arith.constant 5 : index
    %31 = memref.load %arg1[%30, %c5] : memref<2x8xi32, #tpu.memory_space<smem>>
    %c5_i32 = arith.constant 5 : i32
    %c0_i32_15 = arith.constant 0 : i32
    %32 = tpu.memref_slice %arg2[%31, %c0_i32_15] : memref<64x128xf32, #tpu.memory_space<any>> -> memref<1x128xf32, #tpu.memory_space<any>>
    %c5_i32_16 = arith.constant 5 : i32
    %c0_i32_17 = arith.constant 0 : i32
    %33 = tpu.memref_slice %arg5[%c5_i32_16, %c0_i32_17] : memref<8x128xf32, #tpu.memory_space<vmem>> -> memref<1x128xf32, #tpu.memory_space<vmem>>
    %34 = tpu.memref_slice %arg6[%c5_i32] : memref<8x!tpu.dma_semaphore, #tpu.memory_space<semaphore_mem>> -> memref<1x!tpu.dma_semaphore, #tpu.memory_space<semaphore_mem>>
    %35 = tpu.memref_squeeze %34 : memref<1x!tpu.dma_semaphore, #tpu.memory_space<semaphore_mem>> -> memref<!tpu.dma_semaphore, #tpu.memory_space<semaphore_mem>>
    tpu.enqueue_dma source(%32 : memref<1x128xf32, #tpu.memory_space<any>>) target(%33 : memref<1x128xf32, #tpu.memory_space<vmem>>) target_semaphore(%35 : memref<!tpu.dma_semaphore, #tpu.memory_space<semaphore_mem>>)
    %36 = arith.index_cast %arg0 : i32 to index
    %c6 = arith.constant 6 : index
    %37 = memref.load %arg1[%36, %c6] : memref<2x8xi32, #tpu.memory_space<smem>>
    %c6_i32 = arith.constant 6 : i32
    %c0_i32_18 = arith.constant 0 : i32
    %38 = tpu.memref_slice %arg2[%37, %c0_i32_18] : memref<64x128xf32, #tpu.memory_space<any>> -> memref<1x128xf32, #tpu.memory_space<any>>
    %c6_i32_19 = arith.constant 6 : i32
    %c0_i32_20 = arith.constant 0 : i32
    %39 = tpu.memref_slice %arg5[%c6_i32_19, %c0_i32_20] : memref<8x128xf32, #tpu.memory_space<vmem>> -> memref<1x128xf32, #tpu.memory_space<vmem>>
    %40 = tpu.memref_slice %arg6[%c6_i32] : memref<8x!tpu.dma_semaphore, #tpu.memory_space<semaphore_mem>> -> memref<1x!tpu.dma_semaphore, #tpu.memory_space<semaphore_mem>>
    %41 = tpu.memref_squeeze %40 : memref<1x!tpu.dma_semaphore, #tpu.memory_space<semaphore_mem>> -> memref<!tpu.dma_semaphore, #tpu.memory_space<semaphore_mem>>
    tpu.enqueue_dma source(%38 : memref<1x128xf32, #tpu.memory_space<any>>) target(%39 : memref<1x128xf32, #tpu.memory_space<vmem>>) target_semaphore(%41 : memref<!tpu.dma_semaphore, #tpu.memory_space<semaphore_mem>>)
    %42 = arith.index_cast %arg0 : i32 to index
    %c7 = arith.constant 7 : index
    %43 = memref.load %arg1[%42, %c7] : memref<2x8xi32, #tpu.memory_space<smem>>
    %c7_i32 = arith.constant 7 : i32
    %c0_i32_21 = arith.constant 0 : i32
    %44 = tpu.memref_slice %arg2[%43, %c0_i32_21] : memref<64x128xf32, #tpu.memory_space<any>> -> memref<1x128xf32, #tpu.memory_space<any>>
    %c7_i32_22 = arith.constant 7 : i32
    %c0_i32_23 = arith.constant 0 : i32
    %45 = tpu.memref_slice %arg5[%c7_i32_22, %c0_i32_23] : memref<8x128xf32, #tpu.memory_space<vmem>> -> memref<1x128xf32, #tpu.memory_space<vmem>>
    %46 = tpu.memref_slice %arg6[%c7_i32] : memref<8x!tpu.dma_semaphore, #tpu.memory_space<semaphore_mem>> -> memref<1x!tpu.dma_semaphore, #tpu.memory_space<semaphore_mem>>
    %47 = tpu.memref_squeeze %46 : memref<1x!tpu.dma_semaphore, #tpu.memory_space<semaphore_mem>> -> memref<!tpu.dma_semaphore, #tpu.memory_space<semaphore_mem>>
    tpu.enqueue_dma source(%44 : memref<1x128xf32, #tpu.memory_space<any>>) target(%45 : memref<1x128xf32, #tpu.memory_space<vmem>>) target_semaphore(%47 : memref<!tpu.dma_semaphore, #tpu.memory_space<semaphore_mem>>)
    %48 = arith.index_cast %arg0 : i32 to index
    %c0_24 = arith.constant 0 : index
    %49 = memref.load %arg1[%48, %c0_24] : memref<2x8xi32, #tpu.memory_space<smem>>
    %c0_i32_25 = arith.constant 0 : i32
    %c0_i32_26 = arith.constant 0 : i32
    %50 = tpu.memref_slice %arg2[%49, %c0_i32_26] : memref<64x128xf32, #tpu.memory_space<any>> -> memref<1x128xf32, #tpu.memory_space<any>>
    %c0_i32_27 = arith.constant 0 : i32
    %c0_i32_28 = arith.constant 0 : i32
    %51 = tpu.memref_slice %arg5[%c0_i32_27, %c0_i32_28] : memref<8x128xf32, #tpu.memory_space<vmem>> -> memref<1x128xf32, #tpu.memory_space<vmem>>
    %52 = tpu.memref_slice %arg6[%c0_i32_25] : memref<8x!tpu.dma_semaphore, #tpu.memory_space<semaphore_mem>> -> memref<1x!tpu.dma_semaphore, #tpu.memory_space<semaphore_mem>>
    %53 = tpu.memref_squeeze %52 : memref<1x!tpu.dma_semaphore, #tpu.memory_space<semaphore_mem>> -> memref<!tpu.dma_semaphore, #tpu.memory_space<semaphore_mem>>
    tpu.wait_dma2 semaphore(%53 : memref<!tpu.dma_semaphore, #tpu.memory_space<semaphore_mem>>) src(%50 : memref<1x128xf32, #tpu.memory_space<any>>) dst(%51 : memref<1x128xf32, #tpu.memory_space<vmem>>)
    %54 = arith.index_cast %arg0 : i32 to index
    %c1_29 = arith.constant 1 : index
    %55 = memref.load %arg1[%54, %c1_29] : memref<2x8xi32, #tpu.memory_space<smem>>
    %c1_i32_30 = arith.constant 1 : i32
    %c0_i32_31 = arith.constant 0 : i32
    %56 = tpu.memref_slice %arg2[%55, %c0_i32_31] : memref<64x128xf32, #tpu.memory_space<any>> -> memref<1x128xf32, #tpu.memory_space<any>>
    %c1_i32_32 = arith.constant 1 : i32
    %c0_i32_33 = arith.constant 0 : i32
    %57 = tpu.memref_slice %arg5[%c1_i32_32, %c0_i32_33] : memref<8x128xf32, #tpu.memory_space<vmem>> -> memref<1x128xf32, #tpu.memory_space<vmem>>
    %58 = tpu.memref_slice %arg6[%c1_i32_30] : memref<8x!tpu.dma_semaphore, #tpu.memory_space<semaphore_mem>> -> memref<1x!tpu.dma_semaphore, #tpu.memory_space<semaphore_mem>>
    %59 = tpu.memref_squeeze %58 : memref<1x!tpu.dma_semaphore, #tpu.memory_space<semaphore_mem>> -> memref<!tpu.dma_semaphore, #tpu.memory_space<semaphore_mem>>
    tpu.wait_dma2 semaphore(%59 : memref<!tpu.dma_semaphore, #tpu.memory_space<semaphore_mem>>) src(%56 : memref<1x128xf32, #tpu.memory_space<any>>) dst(%57 : memref<1x128xf32, #tpu.memory_space<vmem>>)
    %60 = arith.index_cast %arg0 : i32 to index
    %c2_34 = arith.constant 2 : index
    %61 = memref.load %arg1[%60, %c2_34] : memref<2x8xi32, #tpu.memory_space<smem>>
    %c2_i32_35 = arith.constant 2 : i32
    %c0_i32_36 = arith.constant 0 : i32
    %62 = tpu.memref_slice %arg2[%61, %c0_i32_36] : memref<64x128xf32, #tpu.memory_space<any>> -> memref<1x128xf32, #tpu.memory_space<any>>
    %c2_i32_37 = arith.constant 2 : i32
    %c0_i32_38 = arith.constant 0 : i32
    %63 = tpu.memref_slice %arg5[%c2_i32_37, %c0_i32_38] : memref<8x128xf32, #tpu.memory_space<vmem>> -> memref<1x128xf32, #tpu.memory_space<vmem>>
    %64 = tpu.memref_slice %arg6[%c2_i32_35] : memref<8x!tpu.dma_semaphore, #tpu.memory_space<semaphore_mem>> -> memref<1x!tpu.dma_semaphore, #tpu.memory_space<semaphore_mem>>
    %65 = tpu.memref_squeeze %64 : memref<1x!tpu.dma_semaphore, #tpu.memory_space<semaphore_mem>> -> memref<!tpu.dma_semaphore, #tpu.memory_space<semaphore_mem>>
    tpu.wait_dma2 semaphore(%65 : memref<!tpu.dma_semaphore, #tpu.memory_space<semaphore_mem>>) src(%62 : memref<1x128xf32, #tpu.memory_space<any>>) dst(%63 : memref<1x128xf32, #tpu.memory_space<vmem>>)
    %66 = arith.index_cast %arg0 : i32 to index
    %c3_39 = arith.constant 3 : index
    %67 = memref.load %arg1[%66, %c3_39] : memref<2x8xi32, #tpu.memory_space<smem>>
    %c3_i32_40 = arith.constant 3 : i32
    %c0_i32_41 = arith.constant 0 : i32
    %68 = tpu.memref_slice %arg2[%67, %c0_i32_41] : memref<64x128xf32, #tpu.memory_space<any>> -> memref<1x128xf32, #tpu.memory_space<any>>
    %c3_i32_42 = arith.constant 3 : i32
    %c0_i32_43 = arith.constant 0 : i32
    %69 = tpu.memref_slice %arg5[%c3_i32_42, %c0_i32_43] : memref<8x128xf32, #tpu.memory_space<vmem>> -> memref<1x128xf32, #tpu.memory_space<vmem>>
    %70 = tpu.memref_slice %arg6[%c3_i32_40] : memref<8x!tpu.dma_semaphore, #tpu.memory_space<semaphore_mem>> -> memref<1x!tpu.dma_semaphore, #tpu.memory_space<semaphore_mem>>
    %71 = tpu.memref_squeeze %70 : memref<1x!tpu.dma_semaphore, #tpu.memory_space<semaphore_mem>> -> memref<!tpu.dma_semaphore, #tpu.memory_space<semaphore_mem>>
    tpu.wait_dma2 semaphore(%71 : memref<!tpu.dma_semaphore, #tpu.memory_space<semaphore_mem>>) src(%68 : memref<1x128xf32, #tpu.memory_space<any>>) dst(%69 : memref<1x128xf32, #tpu.memory_space<vmem>>)
    %72 = arith.index_cast %arg0 : i32 to index
    %c4_44 = arith.constant 4 : index
    %73 = memref.load %arg1[%72, %c4_44] : memref<2x8xi32, #tpu.memory_space<smem>>
    %c4_i32_45 = arith.constant 4 : i32
    %c0_i32_46 = arith.constant 0 : i32
    %74 = tpu.memref_slice %arg2[%73, %c0_i32_46] : memref<64x128xf32, #tpu.memory_space<any>> -> memref<1x128xf32, #tpu.memory_space<any>>
    %c4_i32_47 = arith.constant 4 : i32
    %c0_i32_48 = arith.constant 0 : i32
    %75 = tpu.memref_slice %arg5[%c4_i32_47, %c0_i32_48] : memref<8x128xf32, #tpu.memory_space<vmem>> -> memref<1x128xf32, #tpu.memory_space<vmem>>
    %76 = tpu.memref_slice %arg6[%c4_i32_45] : memref<8x!tpu.dma_semaphore, #tpu.memory_space<semaphore_mem>> -> memref<1x!tpu.dma_semaphore, #tpu.memory_space<semaphore_mem>>
    %77 = tpu.memref_squeeze %76 : memref<1x!tpu.dma_semaphore, #tpu.memory_space<semaphore_mem>> -> memref<!tpu.dma_semaphore, #tpu.memory_space<semaphore_mem>>
    tpu.wait_dma2 semaphore(%77 : memref<!tpu.dma_semaphore, #tpu.memory_space<semaphore_mem>>) src(%74 : memref<1x128xf32, #tpu.memory_space<any>>) dst(%75 : memref<1x128xf32, #tpu.memory_space<vmem>>)
    %78 = arith.index_cast %arg0 : i32 to index
    %c5_49 = arith.constant 5 : index
    %79 = memref.load %arg1[%78, %c5_49] : memref<2x8xi32, #tpu.memory_space<smem>>
    %c5_i32_50 = arith.constant 5 : i32
    %c0_i32_51 = arith.constant 0 : i32
    %80 = tpu.memref_slice %arg2[%79, %c0_i32_51] : memref<64x128xf32, #tpu.memory_space<any>> -> memref<1x128xf32, #tpu.memory_space<any>>
    %c5_i32_52 = arith.constant 5 : i32
    %c0_i32_53 = arith.constant 0 : i32
    %81 = tpu.memref_slice %arg5[%c5_i32_52, %c0_i32_53] : memref<8x128xf32, #tpu.memory_space<vmem>> -> memref<1x128xf32, #tpu.memory_space<vmem>>
    %82 = tpu.memref_slice %arg6[%c5_i32_50] : memref<8x!tpu.dma_semaphore, #tpu.memory_space<semaphore_mem>> -> memref<1x!tpu.dma_semaphore, #tpu.memory_space<semaphore_mem>>
    %83 = tpu.memref_squeeze %82 : memref<1x!tpu.dma_semaphore, #tpu.memory_space<semaphore_mem>> -> memref<!tpu.dma_semaphore, #tpu.memory_space<semaphore_mem>>
    tpu.wait_dma2 semaphore(%83 : memref<!tpu.dma_semaphore, #tpu.memory_space<semaphore_mem>>) src(%80 : memref<1x128xf32, #tpu.memory_space<any>>) dst(%81 : memref<1x128xf32, #tpu.memory_space<vmem>>)
    %84 = arith.index_cast %arg0 : i32 to index
    %c6_54 = arith.constant 6 : index
    %85 = memref.load %arg1[%84, %c6_54] : memref<2x8xi32, #tpu.memory_space<smem>>
    %c6_i32_55 = arith.constant 6 : i32
    %c0_i32_56 = arith.constant 0 : i32
    %86 = tpu.memref_slice %arg2[%85, %c0_i32_56] : memref<64x128xf32, #tpu.memory_space<any>> -> memref<1x128xf32, #tpu.memory_space<any>>
    %c6_i32_57 = arith.constant 6 : i32
    %c0_i32_58 = arith.constant 0 : i32
    %87 = tpu.memref_slice %arg5[%c6_i32_57, %c0_i32_58] : memref<8x128xf32, #tpu.memory_space<vmem>> -> memref<1x128xf32, #tpu.memory_space<vmem>>
    %88 = tpu.memref_slice %arg6[%c6_i32_55] : memref<8x!tpu.dma_semaphore, #tpu.memory_space<semaphore_mem>> -> memref<1x!tpu.dma_semaphore, #tpu.memory_space<semaphore_mem>>
    %89 = tpu.memref_squeeze %88 : memref<1x!tpu.dma_semaphore, #tpu.memory_space<semaphore_mem>> -> memref<!tpu.dma_semaphore, #tpu.memory_space<semaphore_mem>>
    tpu.wait_dma2 semaphore(%89 : memref<!tpu.dma_semaphore, #tpu.memory_space<semaphore_mem>>) src(%86 : memref<1x128xf32, #tpu.memory_space<any>>) dst(%87 : memref<1x128xf32, #tpu.memory_space<vmem>>)
    %90 = arith.index_cast %arg0 : i32 to index
    %c7_59 = arith.constant 7 : index
    %91 = memref.load %arg1[%90, %c7_59] : memref<2x8xi32, #tpu.memory_space<smem>>
    %c7_i32_60 = arith.constant 7 : i32
    %c0_i32_61 = arith.constant 0 : i32
    %92 = tpu.memref_slice %arg2[%91, %c0_i32_61] : memref<64x128xf32, #tpu.memory_space<any>> -> memref<1x128xf32, #tpu.memory_space<any>>
    %c7_i32_62 = arith.constant 7 : i32
    %c0_i32_63 = arith.constant 0 : i32
    %93 = tpu.memref_slice %arg5[%c7_i32_62, %c0_i32_63] : memref<8x128xf32, #tpu.memory_space<vmem>> -> memref<1x128xf32, #tpu.memory_space<vmem>>
    %94 = tpu.memref_slice %arg6[%c7_i32_60] : memref<8x!tpu.dma_semaphore, #tpu.memory_space<semaphore_mem>> -> memref<1x!tpu.dma_semaphore, #tpu.memory_space<semaphore_mem>>
    %95 = tpu.memref_squeeze %94 : memref<1x!tpu.dma_semaphore, #tpu.memory_space<semaphore_mem>> -> memref<!tpu.dma_semaphore, #tpu.memory_space<semaphore_mem>>
    tpu.wait_dma2 semaphore(%95 : memref<!tpu.dma_semaphore, #tpu.memory_space<semaphore_mem>>) src(%92 : memref<1x128xf32, #tpu.memory_space<any>>) dst(%93 : memref<1x128xf32, #tpu.memory_space<vmem>>)
    %c0_64 = arith.constant 0 : index
    %c0_65 = arith.constant 0 : index
    %96 = vector.load %arg5[%c0_64, %c0_65] : memref<8x128xf32, #tpu.memory_space<vmem>>, vector<8x128xf32>
    %c0_66 = arith.constant 0 : index
    %c0_67 = arith.constant 0 : index
    %97 = vector.load %arg3[%c0_66, %c0_67] : memref<8x128xf32, #tpu.memory_space<vmem>>, vector<8x128xf32>
    %98 = arith.addf %96, %97 : vector<8x128xf32>
    %c0_68 = arith.constant 0 : index
    %c0_69 = arith.constant 0 : index
    %c0_70 = arith.constant 0 : index
    %99 = vector.load %arg4[%c0_68, %c0_69, %c0_70] : memref<1x8x128xf32, #tpu.memory_space<vmem>>, vector<1x8x128xf32>
    %100 = vector.shape_cast %99 : vector<1x8x128xf32> to vector<8x128xf32>
    %101 = vector.shape_cast %98 : vector<8x128xf32> to vector<1x8x128xf32>
    tpu.vector_store %arg4[%c0_68, %c0_69, %c0_70], %101 {strides = array<i32>} : memref<1x8x128xf32, #tpu.memory_space<vmem>>, vector<1x8x128xf32>,
    return
  }
  func.func @transform_1(%arg0: i32, %arg1: memref<2x8xi32, #tpu.memory_space<smem>>) -> (i32, i32) {
    %c0_i32 = arith.constant 0 : i32
    %c0_i32_0 = arith.constant 0 : i32
    %c0_i32_1 = arith.constant 0 : i32
    return %c0_i32, %c0_i32_0 : i32, i32
  }
  func.func @transform_2(%arg0: i32, %arg1: memref<2x8xi32, #tpu.memory_space<smem>>) -> (i32, i32, i32) {
    %c0_i32 = arith.constant 0 : i32
    %c0_i32_0 = arith.constant 0 : i32
    %c0_i32_1 = arith.constant 0 : i32
    return %arg0, %c0_i32, %c0_i32_0 : i32, i32, i32
  }
}

</mosaic_0001>

<bundles_post_ra>
// kernel: tpu_custom_call.1
= control target key start
LH: loop header
LB: loop body
LE: loop exit
PB: predicated region body
PF: predicated region fallthrough
CT: control target
= control target key end

     0   :  { %s1130_s0 = inlined_call_operand.hbm [shape: s32[2,8], index: 0, kind: input, shape index: {}]   ;;  %s1131_s1 = inlined_call_operand.hbm [shape: f32[64,128], index: 1, kind: input, shape index: {}]   ;;  %s1132_s2 = inlined_call_operand.hbm [shape: f32[8,128], index: 2, kind: input, shape index: {}]   ;;  %s1133_s3 = inlined_call_operand.hbm [shape: f32[2,8,128], index: 3, kind: output, shape index: {}]  }
   0x1   :  { %1138 = sst [smem:[#allocation39_spill]] %s1132_s2  ;;  %s507_s14 = scalar_lea.hbm %s1130_s0, 32 }
   0x2   :  { %p508_p0 = scmp.ne.s32.totalorder %s1130_s0, %s507_s14  ;;  %p511_p1 = scmp.lt.u32.totalorder %s507_s14, %s1130_s0 }
   0x4   :  { %p513_p2 = pnand %p511_p1, %p508_p0 }
   0x6   :  { %516 = shalt.err (!%p513_p2)  }
   0x7   :  { %s823_s19 = smov [#allocation5]  }
   0x8   :  { %9 = dma.hbm_to_smem %s1130_s0, 32, %s823_s19, [#allocation4] }
   0x9   :  { %781 = dma.done.wait [#allocation4], 32 }
   0xa   :  { %782 = vsyncadd [#allocation4], 4294967264 }
   0xb   :  { %11 = sfence }
   0xc   :  { %12 = vsyncpa [#allocation7], 0 }
   0xd   :  { %13 = vsyncpa [#allocation8], 0 }
   0xe   :  { %15 = vsyncpa [#allocation8 + $0x1], 0  ;;  %s866_s22 = smov 0   ;;  %s868_s23 = smov 0  }
   0xf   :  { %s870_s24 = smov 0   ;;  %s872_s25 = smov 0  }
  0x10 LB: > { %s887_s0 = sadd.s32 4294967295, %s821_s25   ;;  %s421_s26 = sadd.s32 4294967294, %s821_s25   ;;  %s821_s25 = sphi %s872_s25, %s1153_s25   ;;  %s817_s24 = sphi %s870_s24, %s1152_s24   ;;  %s813_s23 = sphi %s868_s23, %s1151_s23   ;;  %s809_s22 = sphi %s866_s22, %s1150_s22  }
  0x11   : > { %s891_s27 = sadd.s32 1, %s821_s25   ;;  %s49_s28 = sadd.s32 1, %s817_s24 }
  0x12   : > { %s46_s29 = ssub.s32 %s821_s25, %s891_s27  ;;  %p59_p3 = scmp.ne.s32.totalorder %s817_s24, %s813_s23 }
  0x13   : > { %p47_p4 = scmp.eq.s32.totalorder %s46_s29, 0  ;;  %p60_p5 = scmp.eq.s32.totalorder %s887_s0, 1 }
  0x14   : > { %p65_p6 = scmp.ne.s32.totalorder %s813_s23, %s809_s22  ;;  %p66_p7 = scmp.eq.s32.totalorder %s421_s26, 1 }
  0x15   : > { %s902_s30 = scalar_select %p47_p4, %s817_s24, %s49_s28  }
  0x16   : > { %p904_p8 = por %p60_p5, %p59_p3  ;;  %p908_p9 = por %p66_p7, %p65_p6 }
  0x17   : > { %p422_p10 = scmp.ge.s32.totalorder %s821_s25, 1  ;;  %p73_p11 = scmp.lt.s32.totalorder %s821_s25, 3 }
  0x18   : > { %s1139_s4 = scalar_select %p904_p8, 1, 0 }
  0x19   : > { %s1140_s5 = scalar_select %p908_p9, 1, 0 }
  0x1a   : > { %p1134_p12 = scmp.eq.s32.totalorder %s887_s0, 0  ;;  %p915_p13 = pnand %p422_p10, %p73_p11 }
  0x1b   : > { %s824_s7 = smov [#allocation6]   ;;  %s1143_s2 = sld [smem:[#allocation39_spill]] }
  0x1c   : > { %s1141_s6 = scalar_select %p915_p13, 1, 0 }
  0x1d   : > { %s86_s8 = sshll.u32 %s824_s7, 4  ;;  %p454_p0 = pneg %p915_p13  ;;  %s87_s8 = int_to_ptr.vmem [resolvable:$true] %s86_s8 }
  0x1f   : > { %p923_p1 = pnand %p1134_p12, %p454_p0 }
  0x21   : > { %s517_s12 = scalar_lea.hbm %s1143_s2, 128  ;;  %p519_p3 = pneg %p923_p1 }
  0x22   : > { %p518_p2 = scmp.ne.s32.totalorder %s1143_s2, %s517_s12  ;;  %p524_p6 = scmp.lt.u32.totalorder %s517_s12, %s1143_s2 }
  0x24   : > { %p520_p4 = pnand %p519_p3, %p518_p2 }
  0x26   : > { %p521_p5 = pneg %p520_p4 }
  0x28   : > { %p526_p7 = pnand %p524_p6, %p521_p5 }
  0x2a   : > { %529 = shalt.err (!%p526_p7)
}
  0x2b   : > { %s530_s17 = scalar_lea.vmem %s87_s8, 128  ;;  %p538_p12 = scmp.lt.s32.totalorder %s87_s8, %s87_s8 }
  0x2c   : > { %p531_p10 = scmp.ne.s32.totalorder %s87_s8, %s530_s17  ;;  %p539_p9 = scmp.lt.s32.totalorder %s530_s17, %s530_s17 }
  0x2e   : > { %p533_p11 = pnand %p531_p10, %p519_p3  ;;  %p540_p8 = por %p539_p9, %p538_p12 }
  0x30   : > { %p534_p0 = pneg %p533_p11 }
  0x32   : > { %p541_p13 = pnand %p540_p8, %p534_p0 }
  0x34   : > { %544 = shalt.err (!%p541_p13)
}
  0x35   : > { %457 = dma.hbm_to_vmem [thread:$0]  (!%p923_p1), %s1143_s2, 128, %s87_s8, [#allocation7]  }
  0x36   : > { %p1144_p2 = scmp.ne.s32.totalorder %s1141_s6, 0 }
  0x37   : > { %p1145_p4 = scmp.eq.s32.totalorder (!%p1144_p2), %s887_s0, 0 }
  0x38   : > { %99 = sbr.rel (%p1144_p2) target bundleno = 286 (0x11e), region = 24 }
  0x3f   : > { %784 = dma.done.wait (%p1145_p4), [#allocation7], 128   ;;  %p1146_p3 = pmov %p1145_p4 }
  0x40   : > { %s1137_s20 = sand.u32 1, %s813_s23   ;;  %s951_s21 = sshll.u32 %s887_s0, 7 }
  0x41   : > { %786 = vsyncadd (%p1146_p3), [#allocation7], 4294967168  ;;  %s955_s26 = sshll.u32 %s1137_s20, 3  ;;  %s115_s28 = sld [smem:[#allocation5 + %s951_s21]] }
  0x42   : > { %s825_s29 = smov [#allocation2]   ;;  %s129_s7 = sadd.s32 1, %s951_s21 }
  0x43   : > { %s125_s6 = sshll.u32 %s825_s29, 4  ;;  %s961_s8 = sld [smem:[#allocation5 + %s129_s7]]  ;;  %s959_s6 = int_to_ptr.vmem [resolvable:$true] %s125_s6 }
  0x44   : > { %s146_s9 = sadd.s32 2, %s951_s21  ;;  %s826_s10 = smov [#allocation2 + $0x1]  }
  0x45   : > { %s142_s11 = sshll.u32 %s826_s10, 4  ;;  %s964_s12 = sld [smem:[#allocation5 + %s146_s9]]  ;;  %s966_s11 = int_to_ptr.vmem [resolvable:$true] %s142_s11 }
  0x46   : > { %s974_s19 = scalar_lea.hbm %s1131_s1, 1024 }
  0x47   : > { %s428_s0 = sshll.u32 %s115_s28, 4 }
  0x48   : > { %s117_s15 = scalar_lea.hbm %s1131_s1, %s428_s0 }
  0x49   : > { %s545_s16 = scalar_lea.hbm %s117_s15, 16  ;;  %p548_p9 = scmp.lt.u32.totalorder %s117_s15, %s1131_s1 }
  0x4a   : > { %p546_p8 = scmp.ne.s32.totalorder %s117_s15, %s545_s16  ;;  %p549_p12 = scmp.lt.u32.totalorder %s974_s19, %s545_s16 }
  0x4b   : > { %p551_p1 = scmp.lt.u32.totalorder %s545_s16, %s117_s15 }
  0x4c   : > { %p550_p13 = por %p549_p12, %p548_p9 }
  0x4e   : > { %p552_p5 = por %p551_p1, %p550_p13 }
  0x50   : > { %p553_p6 = pnand %p552_p5, %p546_p8 }
  0x52   : > { %556 = shalt.err (!%p553_p6)  }
  0x53   : > { %s557_s28 = scalar_lea.vmem %s959_s6, 16  ;;  %s983_s9 = scalar_lea.vmem %s959_s6, 128 }
  0x54   : > { %p558_p7 = scmp.ne.s32.totalorder %s959_s6, %s557_s28  ;;  %p562_p10 = scmp.lt.s32.totalorder %s959_s6, %s959_s6 }
  0x55   : > { %p563_p11 = scmp.lt.s32.totalorder %s983_s9, %s557_s28 }
  0x57   : > { %p564_p0 = por %p563_p11, %p562_p10 }
  0x59   : > { %p565_p2 = pnand %p564_p0, %p558_p7 }
  0x5b   : > { %568 = shalt.err (!%p565_p2)  }
  0x5c   : > { %128 = dma.hbm_to_vmem [thread:$0]  %s117_s15, 16, %s959_s6, [#allocation3] }
  0x5d   : > { %s429_s10 = sshll.u32 %s961_s8, 4  ;;  %s827_s0 = smov [#allocation2 + $0x2]  }
  0x5e   : > { %s159_s13 = sshll.u32 %s827_s0, 4  ;;  %s132_s17 = scalar_lea.hbm %s1131_s1, %s429_s10  ;;  %s993_s13 = int_to_ptr.vmem [resolvable:$true] %s159_s13 }
  0x5f   : > { %s569_s18 = scalar_lea.hbm %s132_s17, 16  ;;  %p572_p3 = scmp.lt.u32.totalorder %s132_s17, %s1131_s1 }
  0x60   : > { %p570_p4 = scmp.ne.s32.totalorder %s132_s17, %s569_s18  ;;  %p573_p8 = scmp.lt.u32.totalorder %s974_s19, %s569_s18 }
  0x61   : > { %p575_p12 = scmp.lt.u32.totalorder %s569_s18, %s132_s17 }
  0x62   : > { %p574_p9 = por %p573_p8, %p572_p3 }
  0x64   : > { %p576_p13 = por %p575_p12, %p574_p9 }
  0x66   : > { %p577_p1 = pnand %p576_p13, %p570_p4 }
  0x68   : > { %580 = shalt.err (!%p577_p1)  }
  0x69   : > { %s581_s8 = scalar_lea.vmem %s966_s11, 16  ;;  %p586_p6 = scmp.lt.s32.totalorder %s966_s11, %s959_s6 }
  0x6a   : > { %p582_p5 = scmp.ne.s32.totalorder %s966_s11, %s581_s8  ;;  %p587_p7 = scmp.lt.s32.totalorder %s983_s9, %s581_s8 }
  0x6c   : > { %p588_p10 = por %p587_p7, %p586_p6 }
  0x6e   : > { %p589_p11 = pnand %p588_p10, %p582_p5 }
  0x70   : > { %592 = shalt.err (!%p589_p11)  }
  0x71   : > { %145 = dma.hbm_to_vmem [thread:$0]  %s132_s17, 16, %s966_s11, [#allocation3 + $0x1] }
  0x72   : > { %s430_s15 = sshll.u32 %s964_s12, 4  ;;  %s163_s28 = sadd.s32 3, %s951_s21 }
  0x73   : > { %s149_s14 = scalar_lea.hbm %s1131_s1, %s430_s15  ;;  %s1010_s16 = sld [smem:[#allocation5 + %s163_s28]] }
  0x74   : > { %s593_s18 = scalar_lea.hbm %s149_s14, 16  ;;  %p596_p2 = scmp.lt.u32.totalorder %s149_s14, %s1131_s1 }
  0x75   : > { %p594_p0 = scmp.ne.s32.totalorder %s149_s14, %s593_s18  ;;  %p597_p4 = scmp.lt.u32.totalorder %s974_s19, %s593_s18 }
  0x76   : > { %p599_p8 = scmp.lt.u32.totalorder %s593_s18, %s149_s14 }
  0x77   : > { %p598_p3 = por %p597_p4, %p596_p2 }
  0x79   : > { %p600_p9 = por %p599_p8, %p598_p3 }
  0x7b   : > { %p601_p12 = pnand %p600_p9, %p594_p0 }
  0x7d   : > { %604 = shalt.err (!%p601_p12)  }
  0x7e   : > { %s605_s11 = scalar_lea.vmem %s993_s13, 16  ;;  %p610_p1 = scmp.lt.s32.totalorder %s993_s13, %s959_s6 }
  0x7f   : > { %p606_p13 = scmp.ne.s32.totalorder %s993_s13, %s605_s11  ;;  %p611_p5 = scmp.lt.s32.totalorder %s983_s9, %s605_s11 }
  0x81   : > { %p612_p6 = por %p611_p5, %p610_p1 }
  0x83   : > { %p613_p7 = pnand %p612_p6, %p606_p13 }
  0x85   : > { %616 = shalt.err (!%p613_p7)  }
  0x86   : > { %162 = dma.hbm_to_vmem [thread:$0]  %s149_s14, 16, %s993_s13, [#allocation3 + $0x2] }
  0x87   : > { %s180_s12 = sadd.s32 4, %s951_s21  ;;  %s828_s17 = smov [#allocation2 + $0x3]  }
  0x88   : > { %s176_s8 = sshll.u32 %s828_s17, 4  ;;  %s181_s15 = sld [smem:[#allocation5 + %s180_s12]]  ;;  %s177_s8 = int_to_ptr.vmem [resolvable:$true] %s176_s8 }
  0x89   : > { %s829_s28 = smov [#allocation2 + $0x4]   ;;  %s197_s0 = sadd.s32 5, %s951_s21 }
  0x8a   : > { %s193_s10 = sshll.u32 %s829_s28, 4  ;;  %s431_s18 = sshll.u32 %s1010_s16, 4  ;;  %s1025_s10 = int_to_ptr.vmem [resolvable:$true] %s193_s10 }
  0x8b   : > { %s166_s11 = scalar_lea.hbm %s1131_s1, %s431_s18  ;;  %s1030_s20 = sld [smem:[#allocation5 + %s197_s0]] }
  0x8c   : > { %s617_s2 = scalar_lea.hbm %s166_s11, 16  ;;  %p620_p11 = scmp.lt.u32.totalorder %s166_s11, %s1131_s1 }
  0x8d   : > { %p618_p10 = scmp.ne.s32.totalorder %s166_s11, %s617_s2  ;;  %p621_p0 = scmp.lt.u32.totalorder %s974_s19, %s617_s2 }
  0x8e   : > { %p623_p4 = scmp.lt.u32.totalorder %s617_s2, %s166_s11 }
  0x8f   : > { %p622_p2 = por %p621_p0, %p620_p11 }
  0x91   : > { %p624_p3 = por %p623_p4, %p622_p2 }
  0x93   : > { %p625_p8 = pnand %p624_p3, %p618_p10 }
  0x95   : > { %628 = shalt.err (!%p625_p8)  }
  0x96   : > { %s629_s16 = scalar_lea.vmem %s177_s8, 16  ;;  %p634_p12 = scmp.lt.s32.totalorder %s177_s8, %s959_s6 }
  0x97   : > { %p630_p9 = scmp.ne.s32.totalorder %s177_s8, %s629_s16  ;;  %p635_p13 = scmp.lt.s32.totalorder %s983_s9, %s629_s16 }
  0x99   : > { %p636_p1 = por %p635_p13, %p634_p12 }
  0x9b   : > { %p637_p5 = pnand %p636_p1, %p630_p9 }
  0x9d   : > { %640 = shalt.err (!%p637_p5)  }
  0x9e   : > { %179 = dma.hbm_to_vmem [thread:$0]  %s166_s11, 16, %s177_s8, [#allocation3 + $0x3] }
  0x9f   : > { %s432_s12 = sshll.u32 %s181_s15, 4  ;;  %s830_s2 = smov [#allocation2 + $0x5]  }
  0xa0   : > { %s183_s0 = scalar_lea.hbm %s1131_s1, %s432_s12  ;;  %s210_s18 = sshll.u32 %s830_s2, 4  ;;  %s211_s18 = int_to_ptr.vmem [resolvable:$true] %s210_s18 }
  0xa1   : > { %s641_s29 = scalar_lea.hbm %s183_s0, 16  ;;  %p644_p7 = scmp.lt.u32.totalorder %s183_s0, %s1131_s1 }
  0xa2   : > { %p642_p6 = scmp.ne.s32.totalorder %s183_s0, %s641_s29  ;;  %p645_p10 = scmp.lt.u32.totalorder %s974_s19, %s641_s29 }
  0xa3   : > { %p647_p0 = scmp.lt.u32.totalorder %s641_s29, %s183_s0 }
  0xa4   : > { %p646_p11 = por %p645_p10, %p644_p7 }
  0xa6   : > { %p648_p2 = por %p647_p0, %p646_p11 }
  0xa8   : > { %p649_p4 = pnand %p648_p2, %p642_p6 }
  0xaa   : > { %652 = shalt.err (!%p649_p4)  }
  0xab   : > { %s653_s8 = scalar_lea.vmem %s1025_s10, 16  ;;  %p658_p8 = scmp.lt.s32.totalorder %s1025_s10, %s959_s6 }
  0xac   : > { %p654_p3 = scmp.ne.s32.totalorder %s1025_s10, %s653_s8  ;;  %p659_p9 = scmp.lt.s32.totalorder %s983_s9, %s653_s8 }
  0xae   : > { %p660_p12 = por %p659_p9, %p658_p8 }
  0xb0   : > { %p661_p13 = pnand %p660_p12, %p654_p3 }
  0xb2   : > { %664 = shalt.err (!%p661_p13)  }
  0xb3   : > { %196 = dma.hbm_to_vmem [thread:$0]  %s183_s0, 16, %s1025_s10, [#allocation3 + $0x4] }
  0xb4   : > { %s214_s15 = sadd.s32 6, %s951_s21  ;;  %s433_s11 = sshll.u32 %s1030_s20, 4 }
  0xb5   : > { %s215_s14 = sld [smem:[#allocation5 + %s214_s15]]  ;;  %s200_s17 = scalar_lea.hbm %s1131_s1, %s433_s11 }
  0xb6   : > { %s665_s28 = scalar_lea.hbm %s200_s17, 16  ;;  %p668_p5 = scmp.lt.u32.totalorder %s200_s17, %s1131_s1 }
  0xb7   : > { %p666_p1 = scmp.ne.s32.totalorder %s200_s17, %s665_s28  ;;  %p669_p6 = scmp.lt.u32.totalorder %s974_s19, %s665_s28 }
  0xb8   : > { %p671_p10 = scmp.lt.u32.totalorder %s665_s28, %s200_s17 }
  0xb9   : > { %p670_p7 = por %p669_p6, %p668_p5 }
  0xbb   : > { %p672_p11 = por %p671_p10, %p670_p7 }
  0xbd   : > { %p673_p0 = pnand %p672_p11, %p666_p1 }
  0xbf   : > { %676 = shalt.err (!%p673_p0)  }
  0xc0   : > { %s677_s10 = scalar_lea.vmem %s211_s18, 16  ;;  %p682_p4 = scmp.lt.s32.totalorder %s211_s18, %s959_s6 }
  0xc1   : > { %p678_p2 = scmp.ne.s32.totalorder %s211_s18, %s677_s10  ;;  %p683_p3 = scmp.lt.s32.totalorder %s983_s9, %s677_s10 }
  0xc3   : > { %p684_p8 = por %p683_p3, %p682_p4 }
  0xc5   : > { %p685_p9 = pnand %p684_p8, %p678_p2 }
  0xc7   : > { %688 = shalt.err (!%p685_p9)  }
  0xc8   : > { %213 = dma.hbm_to_vmem [thread:$0]  %s200_s17, 16, %s211_s18, [#allocation3 + $0x5] }
  0xc9   : > { %s831_s20 = smov [#allocation2 + $0x6]   ;;  %s231_s7 = sadd.s32 7, %s951_s21 }
  0xca   : > { %s227_s0 = sshll.u32 %s831_s20, 4  ;;  %s232_s13 = sld [smem:[#allocation5 + %s231_s7]]  ;;  %s228_s0 = int_to_ptr.vmem [resolvable:$true] %s227_s0 }
  0xcb   : > { %s434_s8 = sshll.u32 %s215_s14, 4  ;;  %s832_s15 = smov [#allocation2 + $0x7]  }
  0xcc   : > { %s244_s11 = sshll.u32 %s832_s15, 4  ;;  %s217_s28 = scalar_lea.hbm %s1131_s1, %s434_s8  ;;  %s245_s11 = int_to_ptr.vmem [resolvable:$true] %s244_s11 }
  0xcd   : > { %s689_s2 = scalar_lea.hbm %s217_s28, 16  ;;  %p692_p13 = scmp.lt.u32.totalorder %s217_s28, %s1131_s1 }
  0xce   : > { %p690_p12 = scmp.ne.s32.totalorder %s217_s28, %s689_s2  ;;  %p693_p1 = scmp.lt.u32.totalorder %s974_s19, %s689_s2 }
  0xcf   : > { %p695_p6 = scmp.lt.u32.totalorder %s689_s2, %s217_s28 }
  0xd0   : > { %p694_p5 = por %p693_p1, %p692_p13 }
  0xd2   : > { %p696_p7 = por %p695_p6, %p694_p5 }
  0xd4   : > { %p697_p10 = pnand %p696_p7, %p690_p12 }
  0xd6   : > { %700 = shalt.err (!%p697_p10)  }
  0xd7   : > { %s701_s18 = scalar_lea.vmem %s228_s0, 16  ;;  %p706_p0 = scmp.lt.s32.totalorder %s228_s0, %s959_s6 }
  0xd8   : > { %p702_p11 = scmp.ne.s32.totalorder %s228_s0, %s701_s18  ;;  %p707_p2 = scmp.lt.s32.totalorder %s983_s9, %s701_s18 }
  0xda   : > { %p708_p4 = por %p707_p2, %p706_p0 }
  0xdc   : > { %p709_p3 = pnand %p708_p4, %p702_p11 }
  0xde   : > { %712 = shalt.err (!%p709_p3)  }
  0xdf   : > { %230 = dma.hbm_to_vmem [thread:$0]  %s217_s28, 16, %s228_s0, [#allocation3 + $0x6] }
  0xe0   : > { %s435_s14 = sshll.u32 %s232_s13, 4 }
  0xe1   : > { %s234_s7 = scalar_lea.hbm %s1131_s1, %s435_s14 }
  0xe2   : > { %s713_s8 = scalar_lea.hbm %s234_s7, 16  ;;  %p716_p9 = scmp.lt.u32.totalorder %s234_s7, %s1131_s1 }
  0xe3   : > { %p714_p8 = scmp.ne.s32.totalorder %s234_s7, %s713_s8  ;;  %p717_p12 = scmp.lt.u32.totalorder %s974_s19, %s713_s8 }
  0xe4   : > { %p719_p1 = scmp.lt.u32.totalorder %s713_s8, %s234_s7 }
  0xe5   : > { %p718_p13 = por %p717_p12, %p716_p9 }
  0xe7   : > { %p720_p5 = por %p719_p1, %p718_p13 }
  0xe9   : > { %p721_p6 = pnand %p720_p5, %p714_p8 }
  0xeb   : > { %724 = shalt.err (!%p721_p6)  }
  0xec   : > { %s725_s0 = scalar_lea.vmem %s245_s11, 16  ;;  %p730_p10 = scmp.lt.s32.totalorder %s245_s11, %s959_s6 }
  0xed   : > { %p726_p7 = scmp.ne.s32.totalorder %s245_s11, %s725_s0  ;;  %p731_p11 = scmp.lt.s32.totalorder %s983_s9, %s725_s0 }
  0xef   : > { %p732_p0 = por %p731_p11, %p730_p10 }
  0xf1   : > { %p733_p2 = pnand %p732_p0, %p726_p7 }
  0xf3   : > { %736 = shalt.err (!%p733_p2)  }
  0xf4   : > { %247 = dma.hbm_to_vmem [thread:$0]  %s234_s7, 16, %s245_s11, [#allocation3 + $0x7] }
  0xf5   : > { %s113_s13 = scalar_lea.vmem [#allocation9], %s955_s26 }
  0xf6   : > { %787 = dma.done.wait [#allocation3], 16 }
  0xf7   : > { %788 = vsyncadd [#allocation3], 4294967280 }
  0xf8   : > { %789 = dma.done.wait [#allocation3 + $0x1], 16 }
  0xf9   : > { %790 = vsyncadd [#allocation3 + $0x1], 4294967280 }
  0xfa   : > { %791 = dma.done.wait [#allocation3 + $0x2], 16 }
  0xfb   : > { %792 = vsyncadd [#allocation3 + $0x2], 4294967280 }
  0xfc   : > { %793 = dma.done.wait [#allocation3 + $0x3], 16 }
  0xfd   : > { %794 = vsyncadd [#allocation3 + $0x3], 4294967280 }
  0xfe   : > { %795 = dma.done.wait [#allocation3 + $0x4], 16 }
  0xff   : > { %796 = vsyncadd [#allocation3 + $0x4], 4294967280 }
 0x100   : > { %797 = dma.done.wait [#allocation3 + $0x5], 16 }
 0x101   : > { %798 = vsyncadd [#allocation3 + $0x5], 4294967280 }
 0x102   : > { %799 = dma.done.wait [#allocation3 + $0x6], 16 }
 0x103   : > { %800 = vsyncadd [#allocation3 + $0x6], 4294967280 }
 0x104   : > { %801 = dma.done.wait [#allocation3 + $0x7], 16 }
 0x105   : > { %802 = vsyncadd [#allocation3 + $0x7], 4294967280  ;;  %s291_s26 = sshll.u32 %s113_s13, 4  ;;  %v273_v0 = vld [vmem:[#allocation2] sm:$0xff]  ;;  %v274_v1 = vld [vmem:[#allocation6] sm:$0xff]  ;;  %s1086_s9 = scalar_lea.hbm %s1133_s3, %s951_s21  ;;  %s1088_s26 = int_to_ptr.vmem [resolvable:$true] %s291_s26 }
 0x106   : > { %v275_v2 = vadd.f32 %v274_v1, %v273_v0  ;;  %s1147_s11 = sand.u32 1, %s813_s23   ;;  %s737_s28 = scalar_lea.vmem %s1088_s26, 128 }
 0x107   : > { %s278_s12 = scalar_lea.sflag [#allocation8], %s1147_s11  ;;  %p738_p4 = scmp.ne.s32.totalorder %s1088_s26, %s737_s28 }
 0x108   : > { %276 = vst [vmem:[%s113_s13] sm:$0xff] %v275_v2  ;;  %p1148_p3 = scmp.ne.s32.totalorder %s1139_s4, 0  ;;  %s833_s2 = smov [#allocation9]  }
 0x109   : > { %s741_s29 = sshll.u32 %s833_s2, 4  ;;  %s742_s29 = int_to_ptr.vmem [resolvable:$false] %s741_s29 }
 0x10a   : > { %p739_p8 = pnand %p738_p4, %p1148_p3  ;;  %s743_s10 = scalar_lea.vmem %s742_s29, 256 }
 0x10b   : > { %p744_p12 = scmp.lt.s32.totalorder %s1088_s26, %s742_s29  ;;  %p745_p13 = scmp.lt.s32.totalorder %s743_s10, %s737_s28 }
 0x10c   : > { %p740_p9 = pneg %p739_p8 }
 0x10d   : > { %p746_p1 = por %p745_p13, %p744_p12 }
 0x10f   : > { %p747_p5 = pnand %p746_p1, %p740_p9 }
 0x111   : > { %750 = shalt.err (!%p747_p5)
}
 0x112   : > { %s751_s21 = scalar_lea.hbm %s1086_s9, 128  ;;  %s755_s17 = scalar_lea.hbm %s1133_s3, 256 }
 0x113   : > { %p752_p6 = scmp.ne.s32.totalorder %s1086_s9, %s751_s21  ;;  %p756_p11 = scmp.lt.u32.totalorder %s1086_s9, %s1133_s3 }
 0x114   : > { %p757_p0 = scmp.lt.u32.totalorder %s755_s17, %s751_s21  ;;  %p759_p4 = scmp.lt.u32.totalorder %s751_s21, %s1086_s9 }
 0x115   : > { %p753_p7 = pnand %p752_p6, %p1148_p3 }
 0x116   : > { %p758_p2 = por %p757_p0, %p756_p11 }
 0x117   : > { %p754_p10 = pneg %p753_p7 }
 0x118   : > { %p760_p8 = por %p759_p4, %p758_p2 }
 0x11a   : > { %p761_p9 = pnand %p760_p8, %p754_p10 }
 0x11c   : > { %764 = shalt.err (!%p761_p9)
}
 0x11d   : > { %452 = dma.vmem_to_hbm [thread:$0]  (%p1148_p3), %s1088_s26, 128, %s1086_s9, %s278_s12  }
 0x11e PF: > { %p464_p12 = scmp.ge.s32.totalorder %s821_s25, 2  ;;  %s303_s8 = sand.u32 1, %s809_s22  }
 0x11f   : > { %p1149_p13 = scmp.ne.s32.totalorder %s1140_s5, 0  ;;  %s304_s15 = scalar_lea.sflag [#allocation8], %s303_s8 }
 0x121   : > { %p459_p1 = pnand %p464_p12, %p1149_p13 }
 0x123   : > { %804 = dma.done.wait (!%p459_p1), %s304_s15, 128  }
 0x124   : > { %806 = vsyncadd (!%p459_p1), %s304_s15, 4294967168  ;;  %p18_p5 = scmp.ge.s32.totalorder %s891_s27, 4   ;;  %s1150_s22 = smov %s813_s23 }
 0x125   : > { %s1151_s23 = smov %s817_s24  ;;  %s1152_s24 = smov %s902_s30 }
 0x126   : > { %s1153_s25 = smov %s891_s27  ;;  %20 = sbr.rel (!%p18_p5) target bundleno = 16 (0x10), region = 122 }
 0x12d   :  { %309 = vsyncpa [#allocation7], 1 }
 0x12e   :  { %311 = vsyncpa [#allocation7 + $0x1], 1 }
 0x12f   :  { %312 = vsyncpa [#allocation8], 1 }
 0x130   :  { %314 = vsyncpa [#allocation8 + $0x1], 1 }
 0x131   :  { %315 = vsyncmov [#allocation3] }
 0x134   :  { %s316_s25 = vpop.sfrf %315 }
 0x135   :  { %p440_p3 = scmp.ne.s32.totalorder %s316_s25, 0 }
 0x137   :  { %320 = shalt.err (%p440_p3)  }
 0x138   :  { %322 = vsyncmov [#allocation3 + $0x1] }
 0x13b   :  { %s323_s4 = vpop.sfrf %322 }
 0x13c   :  { %p441_p6 = scmp.ne.s32.totalorder %s323_s4, 0 }
 0x13e   :  { %327 = shalt.err (%p441_p6)  }
 0x13f   :  { %329 = vsyncmov [#allocation3 + $0x2] }
 0x142   :  { %s330_s5 = vpop.sfrf %329 }
 0x143   :  { %p442_p7 = scmp.ne.s32.totalorder %s330_s5, 0 }
 0x145   :  { %334 = shalt.err (%p442_p7)  }
 0x146   :  { %336 = vsyncmov [#allocation3 + $0x3] }
 0x149   :  { %s337_s30 = vpop.sfrf %336 }
 0x14a   :  { %p443_p10 = scmp.ne.s32.totalorder %s337_s30, 0 }
 0x14c   :  { %341 = shalt.err (%p443_p10)  }
 0x14d   :  { %343 = vsyncmov [#allocation3 + $0x4] }
 0x150   :  { %s344_s1 = vpop.sfrf %343 }
 0x151   :  { %p444_p11 = scmp.ne.s32.totalorder %s344_s1, 0 }
 0x153   :  { %348 = shalt.err (%p444_p11)  }
 0x154   :  { %350 = vsyncmov [#allocation3 + $0x5] }
 0x157   :  { %s351_s3 = vpop.sfrf %350 }
 0x158   :  { %p445_p0 = scmp.ne.s32.totalorder %s351_s3, 0 }
 0x15a   :  { %355 = shalt.err (%p445_p0)  }
 0x15b   :  { %357 = vsyncmov [#allocation3 + $0x6] }
 0x15e   :  { %s358_s22 = vpop.sfrf %357 }
 0x15f   :  { %p446_p2 = scmp.ne.s32.totalorder %s358_s22, 0 }
 0x161   :  { %362 = shalt.err (%p446_p2)  }
 0x162   :  { %364 = vsyncmov [#allocation3 + $0x7] }
 0x165   :  { %s365_s23 = vpop.sfrf %364 }
 0x166   :  { %p447_p4 = scmp.ne.s32.totalorder %s365_s23, 0 }
 0x168   :  { %369 = shalt.err (%p447_p4)  }

</bundles_post_ra>
